<compile_context>
chip_gen: v6e
topology: v6e:2x2x1
jax: 0.10.0
libtpu: 0.0.40
codegen_flags: <defaults>
</compile_context>

<pallas_src>
import jax
import jax.numpy as jnp
from jax.experimental import pallas as pl
from jax.experimental.pallas import tpu as pltpu

_LANE = 128
_SUBLANE = 8
_VMEM_DATA_BUDGET = 24 << 20   # working-set target: fits v7x (64 MiB) with headroom


def _round_up(x, mult):
    return ((x + mult - 1) // mult) * mult


def _vmem_block_bytes(rows, cols, itemsize):
    # VMEM tiles are padded to (8, 128) granularity; slight over-estimate for bf16, fine
    # for a budget.
    r = _round_up(max(rows, 1), _SUBLANE)
    c = _round_up(max(cols, 1), _LANE)
    return r * c * itemsize


def _vmem_bytes_estimate(tm, k, n, in_itemsize, out_itemsize):
    x_blk = _vmem_block_bytes(tm, k, in_itemsize)      # streamed, double-buffered
    o_blk = _vmem_block_bytes(tm, n, out_itemsize)     # streamed, double-buffered
    w_blk = _vmem_block_bytes(k, n, in_itemsize)       # resident (constant index map)
    b_blk = _vmem_block_bytes(1, n, 4)                 # resident, kept f32
    return 2 * (x_blk + o_blk) + 2 * (w_blk + b_blk)


def _emotion_classifier_kernel(x_ref, w_ref, b_ref, o_ref):
    # x_ref: (TM, K)   current tile of flattened sequence rows (possibly ragged last tile)
    # w_ref: (K, N)    dense weight, resident across grid steps (constant block index)
    # b_ref: (1, N)    bias (f32), resident across grid steps
    # o_ref: (TM, N)   narrow output tile (N = num_classes, no lane padding in HBM)
    y = jnp.dot(x_ref[...], w_ref[...], preferred_element_type=jnp.float32)
    y = y + b_ref[...]
    # Dropout in eval mode is identity.
    # TODO(synk): training-mode dropout (pltpu.prng_seed + stateful_bernoulli mask with
    # 1/(1-p) scaling) not implemented; this matches PyTorch eval() semantics.
    # Bias-add + sigmoid stay in f32 (no bf16 VPU/EUP on v5e); cast only at the store.
    o_ref[...] = jax.nn.sigmoid(y).astype(o_ref.dtype)


def emotion_classifier(seq_input, weight, bias, *, row_tile=512, io_dtype=None):
    """seq_input: (..., input_dims); weight: (input_dims, num_classes); bias: (num_classes,).

    weight is stored (K, N) = transposed vs. PyTorch's nn.Linear (N, K), so the kernel
    computes x @ W + b directly. If io_dtype (e.g. jnp.bfloat16) is given, x/weight/output
    use that dtype for HBM traffic while all accumulation/activation math stays in f32.
    """
    *lead, k = seq_input.shape
    kw, n = weight.shape
    assert kw == k, "weight must be (input_dims, num_classes)"

    x2d = seq_input.reshape(-1, k)
    m = x2d.shape[0]

    if io_dtype is not None:
        x2d = x2d.astype(io_dtype)
        weight = weight.astype(io_dtype)
    out_dtype = x2d.dtype
    in_itemsize = jnp.dtype(x2d.dtype).itemsize
    out_itemsize = jnp.dtype(out_dtype).itemsize

    b2d = bias.astype(jnp.float32).reshape(1, n)

    # Row tile: big multiple of 8 for pipelined DMA, but capped so the grid has >=2 steps
    # whenever M allows (so v7x's second TensorCore gets work); then shrink until the
    # double-buffered working set fits the VMEM budget (matters for large production K).
    tm = max(_SUBLANE, min(row_tile, _round_up(pl.cdiv(m, 2), _SUBLANE)))
    while tm > _SUBLANE and _vmem_bytes_estimate(tm, k, n, in_itemsize, out_itemsize) > _VMEM_DATA_BUDGET:
        tm = max(_SUBLANE, _round_up(tm // 2, _SUBLANE))

    vmem_est = _vmem_bytes_estimate(tm, k, n, in_itemsize, out_itemsize)
    vmem_limit = int(min(48 << 20, max(32 << 20, 2 * vmem_est)))

    grid = (pl.cdiv(m, tm),)   # ragged last block handled by Pallas: OOB rows never written

    cost = pl.CostEstimate(
        flops=2 * m * k * n,
        transcendentals=m * n,  # sigmoid
        bytes_accessed=m * k * in_itemsize + k * n * in_itemsize + n * 4 + m * n * out_itemsize,
    )

    out2d = pl.pallas_call(
        _emotion_classifier_kernel,
        out_shape=jax.ShapeDtypeStruct((m, n), out_dtype),
        grid=grid,
        in_specs=[
            pl.BlockSpec((tm, k), lambda i: (i, 0)),   # x rows stream through VMEM
            pl.BlockSpec((k, n), lambda i: (0, 0)),    # weight resident (fetched once)
            pl.BlockSpec((1, n), lambda i: (0, 0)),    # bias resident (fetched once)
        ],
        out_specs=pl.BlockSpec((tm, n), lambda i: (i, 0)),
        compiler_params=pltpu.CompilerParams(
            # Row tiles are independent -> megacore sharding on v7x, neutral on v5e/v6e.
            dimension_semantics=("parallel",),
            vmem_limit_bytes=vmem_limit,
        ),
        cost_estimate=cost,
    )(x2d, weight, b2d)

    return out2d.reshape(*lead, n)


def reference(seq_input, weight, bias):
    y = jnp.einsum("...k,kn->...n", seq_input, weight) + bias
    return jax.nn.sigmoid(y)


if __name__ == "__main__":
    # Small shapes consistent with the module: batch=2, seq=8, input_dims=32, num_classes=4
    batch, seq, input_dims, num_classes = 2, 8, 32, 4

    key = jax.random.PRNGKey(0)
    k_x, k_w, k_b = jax.random.split(key, 3)

    seq_input = jax.random.normal(k_x, (batch, seq, input_dims), dtype=jnp.float32)
    # Deterministic init mimicking nn.Linear's uniform(-1/sqrt(fan_in), 1/sqrt(fan_in))
    bound = 1.0 / jnp.sqrt(jnp.float32(input_dims))
    weight = jax.random.uniform(
        k_w, (input_dims, num_classes), minval=-bound, maxval=bound, dtype=jnp.float32
    )
    bias = jax.random.uniform(
        k_b, (num_classes,), minval=-bound, maxval=bound, dtype=jnp.float32
    )

    ref = jax.block_until_ready(reference(seq_input, weight, bias))

    # f32 I/O path — tight tolerance.
    out = jax.block_until_ready(emotion_classifier(seq_input, weight, bias))
    assert out.shape == (batch, seq, num_classes)
    assert jnp.allclose(out, ref, atol=1e-5, rtol=1e-5)

    # bf16 I/O path (halves HBM traffic; f32 accumulation + activation) — looser tolerance.
    out_bf16 = jax.block_until_ready(
        emotion_classifier(seq_input, weight, bias, io_dtype=jnp.bfloat16)
    )
    assert out_bf16.shape == (batch, seq, num_classes)
    assert out_bf16.dtype == jnp.bfloat16
    assert jnp.allclose(out_bf16.astype(jnp.float32), ref, atol=2e-2, rtol=2e-2)

    print("KERNEL_OK")
</pallas_src>

<mosaic_0001>
module attributes {stable_mosaic.version = 11 : i64} {
  func.func @_emotion_classifier_kernel(%arg0: i32, %arg1: memref<8x32xf32, #tpu.memory_space<vmem>>, %arg2: memref<32x4xf32, #tpu.memory_space<vmem>>, %arg3: memref<1x4xf32, #tpu.memory_space<vmem>>, %arg4: memref<8x4xf32, #tpu.memory_space<vmem>>) attributes {dimension_semantics = [#tpu.dimension_semantics<parallel>], iteration_bounds = array<i64: 2>, scalar_prefetch = 0 : i64, scratch_operands = 0 : i64, tpu.core_type = #tpu.core_type<tc>, window_params = [{transform_indices = @transform_0, window_bounds = array<i64: 8, 32>}, {pipeline_mode = #tpu.pipeline_mode<synchronous>, transform_indices = @transform_1, window_bounds = array<i64: 32, 4>}, {pipeline_mode = #tpu.pipeline_mode<synchronous>, transform_indices = @transform_2, window_bounds = array<i64: 1, 4>}, {transform_indices = @transform_3, window_bounds = array<i64: 8, 4>}]} {
    %c0 = arith.constant 0 : index
    %c0_0 = arith.constant 0 : index
    %0 = vector.load %arg1[%c0, %c0_0] : memref<8x32xf32, #tpu.memory_space<vmem>>, vector<8x32xf32>
    %c0_1 = arith.constant 0 : index
    %c0_2 = arith.constant 0 : index
    %1 = vector.load %arg2[%c0_1, %c0_2] : memref<32x4xf32, #tpu.memory_space<vmem>>, vector<32x4xf32>
    %cst = arith.constant dense<0.000000e+00> : vector<8x4xf32>
    %2 = tpu.matmul %0, %1, %cst {dimension_numbers = #tpu.dot_dimension_numbers<[1], [0], [0], [1], [0, 0, 1, 1], [], []>} : vector<8x32xf32>, vector<32x4xf32>, vector<8x4xf32> -> vector<8x4xf32>
    %c0_3 = arith.constant 0 : index
    %c0_4 = arith.constant 0 : index
    %3 = vector.load %arg3[%c0_3, %c0_4] : memref<1x4xf32, #tpu.memory_space<vmem>>, vector<1x4xf32>
    %4 = vector.broadcast %3 : vector<1x4xf32> to vector<8x4xf32>
    %5 = arith.addf %2, %4 : vector<8x4xf32>
    %6 = arith.negf %5 : vector<8x4xf32>
    %7 = math.exp %6 : vector<8x4xf32>
    %cst_5 = arith.constant 1.000000e+00 : f32
    %8 = vector.broadcast %cst_5 : f32 to vector<8x4xf32>
    %9 = arith.addf %8, %7 : vector<8x4xf32>
    %10 = arith.divf %8, %9 : vector<8x4xf32>
    %c0_6 = arith.constant 0 : index
    %c0_7 = arith.constant 0 : index
    %11 = vector.load %arg4[%c0_6, %c0_7] : memref<8x4xf32, #tpu.memory_space<vmem>>, vector<8x4xf32>
    tpu.vector_store %arg4[%c0_6, %c0_7], %10 {strides = array<i32>} : memref<8x4xf32, #tpu.memory_space<vmem>>, vector<8x4xf32>,
    return
  }
  func.func @transform_0(%arg0: i32) -> (i32, i32) {
    %c0_i32 = arith.constant 0 : i32
    %c0_i32_0 = arith.constant 0 : i32
    return %arg0, %c0_i32 : i32, i32
  }
  func.func @transform_1(%arg0: i32) -> (i32, i32) {
    %c0_i32 = arith.constant 0 : i32
    %c0_i32_0 = arith.constant 0 : i32
    %c0_i32_1 = arith.constant 0 : i32
    return %c0_i32, %c0_i32_0 : i32, i32
  }
  func.func @transform_2(%arg0: i32) -> (i32, i32) {
    %c0_i32 = arith.constant 0 : i32
    %c0_i32_0 = arith.constant 0 : i32
    %c0_i32_1 = arith.constant 0 : i32
    return %c0_i32, %c0_i32_0 : i32, i32
  }
  func.func @transform_3(%arg0: i32) -> (i32, i32) {
    %c0_i32 = arith.constant 0 : i32
    %c0_i32_0 = arith.constant 0 : i32
    return %arg0, %c0_i32 : i32, i32
  }
}

</mosaic_0001>

<bundles_post_ra>
// kernel: tpu_custom_call.1
= control target key start
LH: loop header
LB: loop body
LE: loop exit
PB: predicated region body
PF: predicated region fallthrough
CT: control target
= control target key end

     0   :  { %s385_s12 = smov 0   ;;  %s417_s0 = inlined_call_operand.vmem [shape: f32[16,32], index: 0, kind: input, shape index: {}]   ;;  %s418_s1 = inlined_call_operand.vmem [shape: f32[32,4], index: 1, kind: input, shape index: {}]   ;;  %s419_s2 = inlined_call_operand.vmem [shape: f32[1,4], index: 2, kind: input, shape index: {}]   ;;  %s420_s3 = inlined_call_operand.vmem [shape: f32[16,4], index: 3, kind: output, shape index: {}]  }
   0x1 LB: > { %s313_s13 = sadd.s32 4294967295, %s361_s12   ;;  %p317_p0 = scmp.ge.s32.totalorder %s361_s12, 1  ;;  %s361_s12 = sphi %s385_s12, %s13_s12  }
   0x2   : > { %p136_p1 = scmp.lt.s32.totalorder %s361_s12, 3 }
   0x4   : > { %p137_p2 = pnand %p317_p0, %p136_p1 }
   0x5   : > { %p158_p3 = scmp.lt.s32.totalorder (!%p137_p2), %s313_s13, 1 }
   0x6   : > { %140 = sbr.rel (%p137_p2) target bundleno = 248 (0xf8), region = 32 }
   0xb   : > { %v170_v0 = vld [vmem:[%s418_s1 + $0x18] sm:$0xff]  ;;  %v363_v1 = vmov 0.0   ;;  %v169_v2 = vld [vmem:[%s418_s1 + $0x10] sm:$0xff]  ;;  %vm364_vm0 = vmmov 0   ;;  %s422_s13 = smov (!%p158_p3, %s313_s13), 1  ;;  %v168_v3 = vld [vmem:[%s418_s1 + $0x8] sm:$0xff] }
   0xc   : > { %330 = vmatprep.subr.mxu0 %v363_v1  ;;  %338 = vmatprep.mubr.msk.f32.mxu0 %vm364_vm0, %v363_v1  ;;  %s318_s20 = sshll.u32 %s422_s13, 3  ;;  %v167_v4 = vld [vmem:[%s418_s1] sm:$0xff]  ;;  %vm178_vm1 = vcmask 261120   ;;  %vm258_vm2 = vcmask 31744  }
   0xd   : > { %331 = vmatpush3.msra.mxu0 %v170_v0  ;;  %s161_s25 = scalar_lea.vmem %s417_s0, %s318_s20  ;;  %v320_v6 = vld [vmem:[%s419_s2] ss:$0 sm:$0xff]  ;;  %s165_s30 = scalar_lea.vmem %s420_s3, %s318_s20 }
   0xe   : > { %332 = vmatprep.subr.mxu0 %v363_v1  ;;  %v166_v5 = vld [vmem:[%s161_s25] sm:$0xff] }
   0xf   : > { %333 = vmatpush3.msra.mxu0 %v169_v2 }
  0x10   : > { %334 = vmatprep.subr.mxu0 %v363_v1 }
  0x11   : > { %335 = vmatpush3.msra.mxu0 %v168_v3 }
  0x12   : > { %336 = vmatprep.subr.mxu0 %v363_v1 }
  0x13   : > { %337 = vmatpush3.msra.mxu0 %v167_v4 }
  0x14   : > { %339 = vmatmul.mubr.msk.f32.vlgmr.msra.gmra.mxu0 %vm178_vm1, %v166_v5 }
  0xd4   : > { %v248_v7 = vpop.f32.mrf.mxu0 }
  0xd5   : > { %v249_v8 = vadd.f32 %v320_v6, %v248_v7 }
  0xd6   : > { %v340_v9 = vpop.f32.mrf.mxu0 }
  0xd7   : > { %v322_v10 = vmul.f32 -1.442695, %v249_v8 }
  0xd9   : > { %351 = vpow2.f32 %v322_v10 }
  0xe6   : > { %v352_v11 = vpop.eup %351 }
  0xe7   : > { %v255_v12 = vadd.f32 1.0, %v352_v11 }
  0xe9   : > { %353 = vrcp.f32 %v255_v12 }
  0xf6   : > { %v354_v13 = vpop.eup %353 }
  0xf7   : > { %259 = vst.msk [vmem:[%s165_s30] sm:$0xff] %vm258_vm2, %v354_v13 }
  0xf8 PF: > { %s13_s12 = sadd.s32 1, %s361_s12  }
  0xf9   : > { %p10_p4 = scmp.ge.s32.totalorder %s13_s12, 4  }
  0xfb   :  { %12 = sbr.rel (!%p10_p4) target bundleno = 1 (0x1), region = 62 }

</bundles_post_ra>
